<compile_context>
chip_gen: v7x
topology: tpu7x:2x2x1
jax: 0.10.0
libtpu: 0.0.40
codegen_flags: <defaults>
</compile_context>

<pallas_src>
import functools
import math

import jax
import jax.numpy as jnp
from jax.experimental import pallas as pl
from jax.experimental.pallas import tpu as pltpu

EPS = 1e-5  # Falcon layer_norm_epsilon


# ------------------------------ tile helpers ------------------------------- #

def _pick(dim, target, granule=1):
    """Largest divisor of `dim` <= target that is a multiple of `granule`
    (falls back to the full dim, which always satisfies TPU layout rules)."""
    if dim <= target:
        return dim
    t = (target // granule) * granule
    while t >= granule:
        if dim % t == 0:
            return t
        t -= granule
    return dim


# ----------------------------- Pallas kernels ------------------------------ #

def _ln_linear_kernel(x_ref, g_ref, b_ref, w_ref, bias_ref, o_ref, y_sc,
                      *, activation):
    """out = act( LayerNorm(x) @ W + bias ).

    LN (f32, VPU/XLU/EUP) is computed once per row tile at j == 0 and cached
    as bf16 in VMEM scratch; every N tile then only runs the MXU matmul plus
    the bias / activation epilogue."""
    j = pl.program_id(1)

    @pl.when(j == 0)
    def _():
        x = x_ref[...].astype(jnp.float32)
        mean = jnp.mean(x, axis=-1, keepdims=True)
        var = jnp.mean(jnp.square(x - mean), axis=-1, keepdims=True)
        y = (x - mean) * jax.lax.rsqrt(var + EPS)
        y = y * g_ref[...].astype(jnp.float32) + b_ref[...].astype(jnp.float32)
        y_sc[...] = y.astype(jnp.bfloat16)

    acc = jnp.dot(y_sc[...], w_ref[...], preferred_element_type=jnp.float32)
    acc = acc + bias_ref[...].astype(jnp.float32)
    if activation == "gelu":
        acc = jax.nn.gelu(acc, approximate=False)   # torch.nn.GELU() exact
    o_ref[...] = acc.astype(o_ref.dtype)


def ln_linear(x2d, gamma, beta, w, bias, activation="none", out_dtype=None,
              tm_target=256, tn_target=512):
    M, K = x2d.shape
    K2, N = w.shape
    assert K == K2
    tm = _pick(M, tm_target, 8)
    tn = _pick(N, tn_target, 128)
    out_dtype = x2d.dtype if out_dtype is None else out_dtype
    kern = functools.partial(_ln_linear_kernel, activation=activation)
    return pl.pallas_call(
        kern,
        out_shape=jax.ShapeDtypeStruct((M, N), out_dtype),
        grid=(M // tm, N // tn),
        in_specs=[pl.BlockSpec((tm, K), lambda i, j: (i, 0)),
                  pl.BlockSpec((1, K), lambda i, j: (0, 0)),
                  pl.BlockSpec((1, K), lambda i, j: (0, 0)),
                  pl.BlockSpec((K, tn), lambda i, j: (0, j)),
                  pl.BlockSpec((1, tn), lambda i, j: (0, j))],
        out_specs=pl.BlockSpec((tm, tn), lambda i, j: (i, j)),
        scratch_shapes=[pltpu.VMEM((tm, K), jnp.bfloat16)],
        compiler_params=pltpu.CompilerParams(
            dimension_semantics=("parallel", "arbitrary")),
    )(x2d, gamma.reshape(1, K), beta.reshape(1, K), w, bias.reshape(1, N))


def _linear_res_kernel(x_ref, w_ref, bias_ref, res_ref, o_ref, acc_ref):
    """K-tiled out = x @ W + bias + residual, f32 accumulator in VMEM."""
    k = pl.program_id(2)

    @pl.when(k == 0)
    def _():
        acc_ref[...] = jnp.zeros_like(acc_ref)

    acc_ref[...] += jnp.dot(x_ref[...].astype(jnp.bfloat16), w_ref[...],
                            preferred_element_type=jnp.float32)

    @pl.when(k == pl.num_programs(2) - 1)
    def _():
        out = (acc_ref[...] + bias_ref[...].astype(jnp.float32)
               + res_ref[...].astype(jnp.float32))
        o_ref[...] = out.astype(o_ref.dtype)


def linear_residual(x2d, w, bias, residual,
                    tm_target=256, tn_target=512, tk_target=512):
    M, K = x2d.shape
    K2, N = w.shape
    assert K == K2 and residual.shape == (M, N)
    tm = _pick(M, tm_target, 8)
    tn = _pick(N, tn_target, 128)
    tk = _pick(K, tk_target, 128)
    return pl.pallas_call(
        _linear_res_kernel,
        out_shape=jax.ShapeDtypeStruct((M, N), residual.dtype),
        grid=(M // tm, N // tn, K // tk),
        in_specs=[pl.BlockSpec((tm, tk), lambda i, j, k: (i, k)),
                  pl.BlockSpec((tk, tn), lambda i, j, k: (k, j)),
                  pl.BlockSpec((1, tn), lambda i, j, k: (0, j)),
                  pl.BlockSpec((tm, tn), lambda i, j, k: (i, j))],
        out_specs=pl.BlockSpec((tm, tn), lambda i, j, k: (i, j)),
        scratch_shapes=[pltpu.VMEM((tm, tn), jnp.float32)],
        compiler_params=pltpu.CompilerParams(
            dimension_semantics=("parallel", "parallel", "arbitrary")),
    )(x2d, w, bias.reshape(1, N), residual)


def _flash_attn_kernel(q_ref, k_ref, v_ref, alibi_ref, mask_ref, o_ref,
                       m_sc, l_sc, acc_sc, *, inv_norm):
    """Online-softmax attention over one (batch, head-group, q-tile) slab;
    kv tiles stream along the last ('arbitrary') grid axis."""
    ki = pl.program_id(3)

    @pl.when(ki == 0)
    def _():
        m_sc[...] = jnp.full_like(m_sc, -jnp.inf)
        l_sc[...] = jnp.zeros_like(l_sc)
        acc_sc[...] = jnp.zeros_like(acc_sc)

    q = q_ref[0].astype(jnp.bfloat16)          # (hg, tq, hd)
    k = k_ref[0].astype(jnp.bfloat16)          # (hg, tk, hd)
    v = v_ref[0].astype(jnp.bfloat16)          # (hg, tk, hd)

    s = jnp.einsum('nqd,nkd->nqk', q, k, preferred_element_type=jnp.float32)
    # HF Falcon (alibi path): logits = (qk + alibi) * inv_norm + additive mask
    s = (s + alibi_ref[0].astype(jnp.float32)) * inv_norm   # alibi (hg,1,tk)
    s = s + mask_ref[0].astype(jnp.float32)                  # mask  (1,tq,tk)

    m_new = jnp.maximum(m_sc[...], jnp.max(s, axis=-1, keepdims=True))
    alpha = jnp.exp(m_sc[...] - m_new)
    p = jnp.exp(s - m_new)
    l_sc[...] = alpha * l_sc[...] + jnp.sum(p, axis=-1, keepdims=True)
    acc_sc[...] = alpha * acc_sc[...] + jnp.einsum(
        'nqk,nkd->nqd', p.astype(jnp.bfloat16), v,
        preferred_element_type=jnp.float32)
    m_sc[...] = m_new

    @pl.when(ki == pl.num_programs(3) - 1)
    def _():
        o_ref[0] = (acc_sc[...] * pl.reciprocal(l_sc[...], approx=True)
                    ).astype(o_ref.dtype)


def flash_attention(q, k, v, alibi4, mask, head_dim,
                    tq_target=256, tk_target=256, hg_target=8):
    """q,k,v: (B, nh, S, hd); alibi4: (B, nh, 1, S); mask: (B, 1, S, S)."""
    B, nh, S, hd = q.shape
    tq = _pick(S, tq_target, 8)
    tk = _pick(S, tk_target, 128)
    hg = _pick(nh, hg_target, 1)
    kern = functools.partial(_flash_attn_kernel, inv_norm=1.0 / math.sqrt(head_dim))
    return pl.pallas_call(
        kern,
        out_shape=jax.ShapeDtypeStruct((B, nh, S, hd), q.dtype),
        grid=(B, nh // hg, S // tq, S // tk),
        in_specs=[
            pl.BlockSpec((1, hg, tq, hd), lambda b, h, qi, ki: (b, h, qi, 0)),
            pl.BlockSpec((1, hg, tk, hd), lambda b, h, qi, ki: (b, h, ki, 0)),
            pl.BlockSpec((1, hg, tk, hd), lambda b, h, qi, ki: (b, h, ki, 0)),
            pl.BlockSpec((1, hg, 1, tk), lambda b, h, qi, ki: (b, h, 0, ki)),
            # additive mask indexed straight from (B,1,S,S): never broadcast to heads
            pl.BlockSpec((1, 1, tq, tk), lambda b, h, qi, ki: (b, 0, qi, ki)),
        ],
        out_specs=pl.BlockSpec((1, hg, tq, hd), lambda b, h, qi, ki: (b, h, qi, 0)),
        scratch_shapes=[pltpu.VMEM((hg, tq, 1), jnp.float32),
                        pltpu.VMEM((hg, tq, 1), jnp.float32),
                        pltpu.VMEM((hg, tq, hd), jnp.float32)],
        compiler_params=pltpu.CompilerParams(
            dimension_semantics=("parallel", "parallel", "parallel", "arbitrary")),
    )(q, k, v, alibi4, mask)


# ------------------------------ model wiring ------------------------------- #

def falcon_block(x2d, p, alibi4, mask, B, S, H, nh, hd):
    # attention branch: fused ln_1 + QKV projection (stored bf16 — feeds bf16 matmuls)
    qkv = ln_linear(x2d, p["ln1_g"], p["ln1_b"], p["wqkv"], p["bqkv"],
                    out_dtype=jnp.bfloat16)                             # (B*S, 3H)
    qkv = qkv.reshape(B, S, nh, 3, hd)                                  # HF _split_heads
    # TODO(synk): emit q/k/v directly in (B, nh, S, hd) from the QKV kernel's
    # out_specs (head-dim lane slices are not 128-aligned, so the split/merge
    # transposes are left to XLA here).
    q = qkv[..., 0, :].transpose(0, 2, 1, 3)   # (B, nh, S, hd)
    k = qkv[..., 1, :].transpose(0, 2, 1, 3)
    v = qkv[..., 2, :].transpose(0, 2, 1, 3)
    ctx = flash_attention(q, k, v, alibi4, mask, hd)                    # (B, nh, S, hd) bf16
    ctx2d = ctx.transpose(0, 2, 1, 3).reshape(B * S, H)
    resid = linear_residual(ctx2d, p["w_dense"], p["b_dense"], x2d)     # + attn residual (f32)

    # MLP branch: fused ln_2 + h->4h + exact GELU (bf16), then 4h->h with fused residual
    h4 = ln_linear(resid, p["ln2_g"], p["ln2_b"], p["w_h4h"], p["b_h4h"],
                   activation="gelu", out_dtype=jnp.bfloat16)
    return linear_residual(h4, p["w_4hh"], p["b_4hh"], resid)           # + mlp residual (f32)


def prep_params(params):
    """Cast matmul weights to bf16 (MXU fast path, half the HBM traffic);
    LayerNorm params and biases stay f32."""
    def cvt(blk):
        q = dict(blk)
        for name in ("wqkv", "w_dense", "w_h4h", "w_4hh"):
            q[name] = blk[name].astype(jnp.bfloat16)
        return q
    out = dict(params)
    out["blocks"] = [cvt(b) for b in params["blocks"]]
    out["w_head"] = params["w_head"].astype(jnp.bfloat16)
    return out


def falcon_top_mocker_forward(params, x, attention_mask, alibi,
                              B, S, H, nh, hd, vocab):
    p = prep_params(params)
    alibi4 = alibi.reshape(B, nh, 1, S)        # free reshape, no broadcast
    x2d = x.reshape(B * S, H)
    for blk in p["blocks"]:
        x2d = falcon_block(x2d, blk, alibi4, attention_mask, B, S, H, nh, hd)
    # fused ln_f + lm_head (no bias)
    logits = ln_linear(x2d, p["lnf_g"], p["lnf_b"], p["w_head"],
                       jnp.zeros((vocab,), jnp.float32), out_dtype=jnp.float32)
    return logits.reshape(B, S, vocab)


def init_params(key, H, nh, num_blocks, vocab):
    def lin(k, shape, scale=0.02):
        return scale * jax.random.normal(k, shape, jnp.float32)

    keys = jax.random.split(key, num_blocks + 1)
    blocks = []
    for i in range(num_blocks):
        bk = jax.random.split(keys[i], 4)
        blocks.append(dict(
            ln1_g=jnp.ones((H,), jnp.float32), ln1_b=jnp.zeros((H,), jnp.float32),
            ln2_g=jnp.ones((H,), jnp.float32), ln2_b=jnp.zeros((H,), jnp.float32),
            wqkv=lin(bk[0], (H, 3 * H)), bqkv=jnp.zeros((3 * H,), jnp.float32),
            w_dense=lin(bk[1], (H, H)), b_dense=jnp.zeros((H,), jnp.float32),
            w_h4h=lin(bk[2], (H, 4 * H)), b_h4h=jnp.zeros((4 * H,), jnp.float32),
            w_4hh=lin(bk[3], (4 * H, H)), b_4hh=jnp.zeros((H,), jnp.float32),
        ))
    return dict(
        blocks=blocks,
        lnf_g=jnp.ones((H,), jnp.float32), lnf_b=jnp.zeros((H,), jnp.float32),
        w_head=lin(keys[-1], (H, vocab)),
    )


if __name__ == "__main__":
    B, S, H, nh, vocab, num_blocks = 2, 8, 32, 4, 256, 2
    hd = H // nh

    key = jax.random.PRNGKey(0)
    kx, kp = jax.random.split(key)
    params = init_params(kp, H, nh, num_blocks, vocab)
    x = jax.random.normal(kx, (B, S, H), jnp.float32)

    # additive causal mask (B, 1, S, S), as passed into Falcon blocks
    causal = jnp.tril(jnp.ones((S, S), dtype=bool))
    attention_mask = jnp.where(causal, 0.0, -1e9).astype(jnp.float32)[None, None]
    attention_mask = jnp.broadcast_to(attention_mask, (B, 1, S, S))

    # alibi tensor (B*nh, 1, S), slopes as in HF build_alibi_tensor (nh power of 2)
    slopes = 2.0 ** (-8.0 * jnp.arange(1, nh + 1, dtype=jnp.float32) / nh)
    alibi = slopes[:, None] * jnp.arange(S, dtype=jnp.float32)[None, :]   # (nh, S)
    alibi = jnp.broadcast_to(alibi[None], (B, nh, S)).reshape(B * nh, 1, S)

    logits = falcon_top_mocker_forward(params, x, attention_mask, alibi,
                                       B, S, H, nh, hd, vocab)
    jax.block_until_ready(logits)
    assert logits.shape == (B, S, vocab)
    assert bool(jnp.all(jnp.isfinite(logits)))
    print("KERNEL_OK")
</pallas_src>

<mosaic_0001>
module attributes {stable_mosaic.version = 11 : i64} {
  func.func @_ln_linear_kernel(%arg0: i32, %arg1: i32, %arg2: memref<16x32xf32, #tpu.memory_space<vmem>>, %arg3: memref<1x32xf32, #tpu.memory_space<vmem>>, %arg4: memref<1x32xf32, #tpu.memory_space<vmem>>, %arg5: memref<32x96xbf16, #tpu.memory_space<vmem>>, %arg6: memref<1x96xf32, #tpu.memory_space<vmem>>, %arg7: memref<16x96xbf16, #tpu.memory_space<vmem>>, %arg8: memref<16x32xbf16, #tpu.memory_space<vmem>>) attributes {dimension_semantics = [#tpu.dimension_semantics<parallel>, #tpu.dimension_semantics<arbitrary>], iteration_bounds = array<i64: 1, 1>, scalar_prefetch = 0 : i64, scratch_operands = 1 : i64, tpu.core_type = #tpu.core_type<tc>, window_params = [{transform_indices = @transform_0, window_bounds = array<i64: 16, 32>}, {pipeline_mode = #tpu.pipeline_mode<synchronous>, transform_indices = @transform_1, window_bounds = array<i64: 1, 32>}, {pipeline_mode = #tpu.pipeline_mode<synchronous>, transform_indices = @transform_2, window_bounds = array<i64: 1, 32>}, {transform_indices = @transform_3, window_bounds = array<i64: 32, 96>}, {transform_indices = @transform_4, window_bounds = array<i64: 1, 96>}, {transform_indices = @transform_5, window_bounds = array<i64: 16, 96>}]} {
    %c0_i32 = arith.constant 0 : i32
    %0 = arith.cmpi eq, %arg1, %c0_i32 : i32
    %1 = arith.extui %0 : i1 to i32
    %c0_i32_0 = arith.constant 0 : i32
    %2 = arith.cmpi ne, %1, %c0_i32_0 : i32
    scf.if %2 {
      %c0_8 = arith.constant 0 : index
      %c0_9 = arith.constant 0 : index
      %11 = vector.load %arg2[%c0_8, %c0_9] : memref<16x32xf32, #tpu.memory_space<vmem>>, vector<16x32xf32>
      %cst_10 = arith.constant dense<0.000000e+00> : vector<16xf32>
      %12 = vector.multi_reduction <add>, %11, %cst_10 [1] : vector<16x32xf32> to vector<16xf32>
      %13 = vector.shape_cast %12 : vector<16xf32> to vector<16x1xf32>
      %cst_11 = arith.constant 3.200000e+01 : f32
      %14 = vector.broadcast %cst_11 : f32 to vector<16x1xf32>
      %15 = arith.divf %13, %14 : vector<16x1xf32>
      %16 = vector.broadcast %15 : vector<16x1xf32> to vector<16x32xf32>
      %17 = arith.subf %11, %16 : vector<16x32xf32>
      %18 = arith.mulf %17, %17 : vector<16x32xf32>
      %cst_12 = arith.constant dense<0.000000e+00> : vector<16xf32>
      %19 = vector.multi_reduction <add>, %18, %cst_12 [1] : vector<16x32xf32> to vector<16xf32>
      %20 = vector.shape_cast %19 : vector<16xf32> to vector<16x1xf32>
      %cst_13 = arith.constant 3.200000e+01 : f32
      %21 = vector.broadcast %cst_13 : f32 to vector<16x1xf32>
      %22 = arith.divf %20, %21 : vector<16x1xf32>
      %23 = vector.broadcast %15 : vector<16x1xf32> to vector<16x32xf32>
      %24 = arith.subf %11, %23 : vector<16x32xf32>
      %cst_14 = arith.constant 9.99999974E-6 : f32
      %25 = vector.broadcast %cst_14 : f32 to vector<16x1xf32>
      %26 = arith.addf %22, %25 : vector<16x1xf32>
      %27 = math.rsqrt %26 : vector<16x1xf32>
      %28 = vector.broadcast %27 : vector<16x1xf32> to vector<16x32xf32>
      %29 = arith.mulf %24, %28 : vector<16x32xf32>
      %c0_15 = arith.constant 0 : index
      %c0_16 = arith.constant 0 : index
      %30 = vector.load %arg3[%c0_15, %c0_16] : memref<1x32xf32, #tpu.memory_space<vmem>>, vector<1x32xf32>
      %31 = vector.broadcast %30 : vector<1x32xf32> to vector<16x32xf32>
      %32 = arith.mulf %29, %31 : vector<16x32xf32>
      %c0_17 = arith.constant 0 : index
      %c0_18 = arith.constant 0 : index
      %33 = vector.load %arg4[%c0_17, %c0_18] : memref<1x32xf32, #tpu.memory_space<vmem>>, vector<1x32xf32>
      %34 = vector.broadcast %33 : vector<1x32xf32> to vector<16x32xf32>
      %35 = arith.addf %32, %34 : vector<16x32xf32>
      %36 = arith.truncf %35 : vector<16x32xf32> to vector<16x32xbf16>
      %c0_19 = arith.constant 0 : index
      %c0_20 = arith.constant 0 : index
      %37 = vector.load %arg8[%c0_19, %c0_20] : memref<16x32xbf16, #tpu.memory_space<vmem>>, vector<16x32xbf16>
      tpu.vector_store %arg8[%c0_19, %c0_20], %36 {strides = array<i32>} : memref<16x32xbf16, #tpu.memory_space<vmem>>, vector<16x32xbf16>,
    } else {
    }
    %c0 = arith.constant 0 : index
    %c0_1 = arith.constant 0 : index
    %3 = vector.load %arg8[%c0, %c0_1] : memref<16x32xbf16, #tpu.memory_space<vmem>>, vector<16x32xbf16>
    %c0_2 = arith.constant 0 : index
    %c0_3 = arith.constant 0 : index
    %4 = vector.load %arg5[%c0_2, %c0_3] : memref<32x96xbf16, #tpu.memory_space<vmem>>, vector<32x96xbf16>
    %cst = arith.constant dense<0.000000e+00> : vector<16x96xf32>
    %5 = tpu.matmul %3, %4, %cst {dimension_numbers = #tpu.dot_dimension_numbers<[1], [0], [0], [1], [0, 0, 1, 1], [], []>} : vector<16x32xbf16>, vector<32x96xbf16>, vector<16x96xf32> -> vector<16x96xf32>
    %c0_4 = arith.constant 0 : index
    %c0_5 = arith.constant 0 : index
    %6 = vector.load %arg6[%c0_4, %c0_5] : memref<1x96xf32, #tpu.memory_space<vmem>>, vector<1x96xf32>
    %7 = vector.broadcast %6 : vector<1x96xf32> to vector<16x96xf32>
    %8 = arith.addf %5, %7 : vector<16x96xf32>
    %9 = arith.truncf %8 : vector<16x96xf32> to vector<16x96xbf16>
    %c0_6 = arith.constant 0 : index
    %c0_7 = arith.constant 0 : index
    %10 = vector.load %arg7[%c0_6, %c0_7] : memref<16x96xbf16, #tpu.memory_space<vmem>>, vector<16x96xbf16>
    tpu.vector_store %arg7[%c0_6, %c0_7], %9 {strides = array<i32>} : memref<16x96xbf16, #tpu.memory_space<vmem>>, vector<16x96xbf16>,
    return
  }
  func.func @transform_0(%arg0: i32, %arg1: i32) -> (i32, i32) {
    %c0_i32 = arith.constant 0 : i32
    %c0_i32_0 = arith.constant 0 : i32
    return %arg0, %c0_i32 : i32, i32
  }
  func.func @transform_1(%arg0: i32, %arg1: i32) -> (i32, i32) {
    %c0_i32 = arith.constant 0 : i32
    %c0_i32_0 = arith.constant 0 : i32
    %c0_i32_1 = arith.constant 0 : i32
    return %c0_i32, %c0_i32_0 : i32, i32
  }
  func.func @transform_2(%arg0: i32, %arg1: i32) -> (i32, i32) {
    %c0_i32 = arith.constant 0 : i32
    %c0_i32_0 = arith.constant 0 : i32
    %c0_i32_1 = arith.constant 0 : i32
    return %c0_i32, %c0_i32_0 : i32, i32
  }
  func.func @transform_3(%arg0: i32, %arg1: i32) -> (i32, i32) {
    %c0_i32 = arith.constant 0 : i32
    %c0_i32_0 = arith.constant 0 : i32
    return %c0_i32, %arg1 : i32, i32
  }
  func.func @transform_4(%arg0: i32, %arg1: i32) -> (i32, i32) {
    %c0_i32 = arith.constant 0 : i32
    %c0_i32_0 = arith.constant 0 : i32
    return %c0_i32, %arg1 : i32, i32
  }
  func.func @transform_5(%arg0: i32, %arg1: i32) -> (i32, i32) {
    %c0_i32 = arith.constant 0 : i32
    return %arg0, %arg1 : i32, i32
  }
}

</mosaic_0001>

<bundles_post_ra>
// kernel: tpu_custom_call.1
= control target key start
LH: loop header
LB: loop body
LE: loop exit
PB: predicated region body
PF: predicated region fallthrough
CT: control target
= control target key end

     0   :  { %10 = vsyncpa [#allocation4], 0  ;;  %s406_s0 = inlined_call_operand.hbm [shape: f32[16,32], index: 0, kind: input, shape index: {}]   ;;  %s407_s1 = inlined_call_operand.vmem [shape: f32[1,32], index: 1, kind: input, shape index: {}]   ;;  %s408_s2 = inlined_call_operand.vmem [shape: f32[1,32], index: 2, kind: input, shape index: {}]   ;;  %s409_s3 = inlined_call_operand.hbm [shape: bf16[32,96], index: 3, kind: input, shape index: {}]   ;;  %s410_s4 = inlined_call_operand.vmem [shape: f32[1,96], index: 4, kind: input, shape index: {}]   ;;  %s411_s5 = inlined_call_operand.hbm [shape: bf16[16,96], index: 5, kind: output, shape index: {}]  }
   0x1   :  { %11 = vsyncpa [#allocation7], 0 }
   0x2   :  { %12 = vsyncpa [#allocation5], 0  ;;  %s310_s18 = smov [#allocation3]   ;;  %s238_s22 = scalar_lea.hbm %s406_s0, 256 }
   0x3   :  { %s18_s19 = sshll.u32 %s310_s18, 4  ;;  %p239_p0 = scmp.ne.s32.totalorder %s406_s0, %s238_s22  ;;  %s19_s19 = int_to_ptr.vmem [resolvable:$true] %s18_s19 }
   0x4   :  { %p242_p1 = scmp.lt.u32.totalorder %s238_s22, %s406_s0 }
   0x6   :  { %p244_p2 = pnand %p242_p1, %p239_p0 }
   0x8   :  { %247 = shalt.err (!%p244_p2)
}
   0x9   :  { %s248_s27 = scalar_lea.vmem %s19_s19, 256  ;;  %p253_p4 = scmp.lt.s32.totalorder %s19_s19, %s19_s19 }
   0xa   :  { %p249_p3 = scmp.ne.s32.totalorder %s19_s19, %s248_s27  ;;  %p254_p5 = scmp.lt.s32.totalorder %s248_s27, %s248_s27 }
   0xc   :  { %p255_p6 = por %p254_p5, %p253_p4 }
   0xe   :  { %p256_p7 = pnand %p255_p6, %p249_p3 }
  0x10   :  { %259 = shalt.err (!%p256_p7)
}
  0x11   :  { %s311_s28 = smov 128   ;;  %s312_s29 = smov 8  }
  0x12   :  { %24 = dma.hbm_to_vmem [thread:$0]  %s406_s0, 256, %s19_s19, [#allocation4], %s311_s28, %s311_s28, %s312_s29  }
  0x13   :  { %s313_s7 = smov [#allocation6]   ;;  %s260_s11 = scalar_lea.hbm %s409_s3, 256 }
  0x14   :  { %s34_s8 = sshll.u32 %s313_s7, 4  ;;  %p261_p8 = scmp.ne.s32.totalorder %s409_s3, %s260_s11  ;;  %s35_s8 = int_to_ptr.vmem [resolvable:$true] %s34_s8 }
  0x15   :  { %p264_p9 = scmp.lt.u32.totalorder %s260_s11, %s409_s3 }
  0x17   :  { %p266_p10 = pnand %p264_p9, %p261_p8 }
  0x19   :  { %269 = shalt.err (!%p266_p10)
}
  0x1a   :  { %s270_s16 = scalar_lea.vmem %s35_s8, 256  ;;  %p275_p12 = scmp.lt.s32.totalorder %s35_s8, %s35_s8 }
  0x1b   :  { %p271_p11 = scmp.ne.s32.totalorder %s35_s8, %s270_s16  ;;  %p276_p13 = scmp.lt.s32.totalorder %s270_s16, %s270_s16 }
  0x1d   :  { %p277_p0 = por %p276_p13, %p275_p12 }
  0x1f   :  { %p278_p1 = pnand %p277_p0, %p271_p11 }
  0x21   :  { %281 = shalt.err (!%p278_p1)
}
  0x22   :  { %s314_s0 = smov 64   ;;  %s315_s17 = smov 4  }
  0x23   :  { %40 = dma.hbm_to_vmem [thread:$0]  %s409_s3, 256, %s35_s8, [#allocation7], %s314_s0, %s314_s0, %s315_s17  }
  0x24   :  { %304 = dma.done.wait [#allocation4], 256  }
  0x25   :  { %305 = vsyncadd [#allocation4], 4294967040 }
  0x26   :  { %306 = dma.done.wait [#allocation7], 256  }
  0x27   :  { %307 = vsyncadd [#allocation7], 4294967040  ;;  %vm56_vm0 = vcmask 261120   ;;  %v54_v0 = vld [vmem:[#allocation3] sm:$0xff]  ;;  %v55_v1 = vld [vmem:[#allocation3 + $0x8] sm:$0xff]  ;;  %v316_v15 = vmov 0.0  }
  0x28   :  { %v57_v2 = vsel %vm56_vm0, %v54_v0, 0.0  ;;  %v60_v3 = vsel %vm56_vm0, %v55_v1, 0.0  ;;  %v232_v14 = vld [vmem:[#allocation6] sm:$0xff]   ;;  %215 = vmatprep.subr.bf16.mxu0 %v316_v15  ;;  %v233_v16 = vld [vmem:[#allocation6 + $0x8] sm:$0xff]   ;;  %vm317_vm1 = vmmov 0   ;;  %vm181_vm2 = vcmask 781312  }
  0x29   :  { %58 = vadd.xlane.f32.xlu0 %v57_v2  ;;  %216 = vmatpush3.bf16.msra.mxu0 %v232_v14  ;;  %v202_v25 = vld [vmem:[%s407_s1] ss:$0 sm:$0xff]  ;;  %s318_s1 = smov [#allocation8]  }
  0x2a   :  { %219 = vmatprep.mubr.msk.bf16.mxu0 %vm317_vm1, %v316_v15  ;;  %217 = vmatprep.subr.bf16.mxu0 %v316_v15  ;;  %v203_v29 = vld [vmem:[%s408_s2] ss:$0 sm:$0xff]  ;;  %s189_s2 = sshll.u32 %s318_s1, 4  ;;  %s190_s2 = int_to_ptr.vmem [resolvable:$true] %s189_s2 }
  0x2b   :  { %v204_v35 = vld [vmem:[%s410_s4] ss:$0 sm:$0xff]  ;;  %s282_s25 = scalar_lea.vmem %s190_s2, 128  ;;  %p287_p3 = scmp.lt.s32.totalorder %s190_s2, %s190_s2 }
  0x2c   :  { %p283_p2 = scmp.ne.s32.totalorder %s190_s2, %s282_s25  ;;  %p288_p4 = scmp.lt.s32.totalorder %s282_s25, %s282_s25 }
  0x2d   :  { %61 = vadd.xlane.f32.xlu0 %v60_v3  ;;  %218 = vmatpush3.bf16.msra.mxu0 %v233_v16 }
  0x2e   :  { %p289_p5 = por %p288_p4, %p287_p3 }
  0x30   :  { %p290_p6 = pnand %p289_p5, %p283_p2 }
  0xb6   :  { %v59_v4 = vpop.xlane.xlu0 %58 }
  0xb7   :  { %v64_v5 = vmul.f32 0.03125, %v59_v4 }
  0xb9   :  { %v66_v6 = vsub.f32 %v54_v0, %v64_v5 }
  0xba   :  { %v62_v7 = vpop.xlane.xlu0 %61 }
  0xbb   :  { %v65_v8 = vmul.f32 0.03125, %v62_v7  ;;  %v68_v9 = vmul.f32 %v66_v6, %v66_v6 }
  0xbd   :  { %v67_v10 = vsub.f32 %v55_v1, %v65_v8  ;;  %v70_v11 = vsel %vm56_vm0, %v68_v9, 0.0 }
  0xbe   :  { %71 = vadd.xlane.f32.xlu1 %v70_v11 }
  0xbf   :  { %v69_v12 = vmul.f32 %v67_v10, %v67_v10 }
  0xc1   :  { %v73_v13 = vsel %vm56_vm0, %v69_v12, 0.0 }
  0xc2   :  { %74 = vadd.xlane.f32.xlu1 %v73_v13 }
 0x14b   :  { %v72_v17 = vpop.xlane.xlu1 %71 }
 0x14c   :  { %v76_v18 = vmul.f32 0.03125, %v72_v17 }
 0x14e   :  { %v78_v19 = vadd.f32 1e-05, %v76_v18 }
 0x14f   :  { %v75_v20 = vpop.xlane.xlu1 %74 }
 0x150   :  { %234 = vrsqrt.f32 %v78_v19  ;;  %v77_v21 = vmul.f32 0.03125, %v75_v20 }
 0x152   :  { %v79_v22 = vadd.f32 1e-05, %v77_v21 }
 0x154   :  { %236 = vrsqrt.f32 %v79_v22 }
 0x15a   :  { %v235_v23 = vpop.eup %234 }
 0x15b   :  { %v82_v24 = vmul.f32 %v235_v23, %v66_v6 }
 0x15d   :  { %v91_v27 = vmul.f32 %v202_v25, %v82_v24 }
 0x15e   :  { %v237_v26 = vpop.eup %236 }
 0x15f   :  { %v83_v28 = vmul.f32 %v237_v26, %v67_v10  ;;  %v100_v31 = vadd.f32 %v203_v29, %v91_v27 }
 0x161   :  { %v92_v30 = vmul.f32 %v202_v25, %v83_v28 }
 0x163   :  { %v101_v32 = vadd.f32 %v203_v29, %v92_v30 }
 0x165   :  { %v102_v33 = vpack.c.bf16 %v101_v32, %v100_v31 }
 0x167   :  { %103 = vst.msk [vmem:[#allocation2] sm:$0xff] %vm56_vm0, %v102_v33 }
 0x16e   :  { %v104_v34 = vld [vmem:[#allocation2] sm:$0xff] }
 0x16f   :  { %220 = vmatmul.mubr.msk.bf16.vlgmr.msra.gmra.mrb[0].mxu0 %vm56_vm0, %v104_v34 }
 0x242   :  { %v166_v36 = vpop.f32.mrb[0].mxu0 }
 0x243   :  { %v167_v37 = vadd.f32 %v204_v35, %v166_v36  ;;  %v221_v38 = vpop.f32.mrb[1].mxu0 }
 0x244   :  { %v169_v39 = vpop.f32.mrb[2].mxu0 }
 0x245   :  { %v210_v40 = vpack.c.bf16 %v167_v37, %v167_v37  ;;  %v170_v41 = vadd.f32 %v204_v35, %v169_v39  ;;  %v222_v42 = vpop.f32.mrb[3].mxu0 }
 0x247   :  { %v211_v43 = vpack.c.bf16 %v170_v41, %v170_v41  ;;  %182 = vst.msk [vmem:[#allocation8] sm:$0xf] %vm181_vm2, %v210_v40 }
 0x249   :  { %183 = vst.msk [vmem:[#allocation8 + $0x4] sm:$0xf] %vm181_vm2, %v211_v43 }
 0x24a   :  { %293 = shalt.err (!%p290_p6)
}
 0x24b   :  { %s294_s27 = scalar_lea.hbm %s411_s5, 128 }
 0x24c   :  { %p295_p7 = scmp.ne.s32.totalorder %s411_s5, %s294_s27  ;;  %p298_p8 = scmp.lt.u32.totalorder %s294_s27, %s411_s5 }
 0x24e   :  { %p300_p9 = pnand %p298_p8, %p295_p7 }
 0x250   :  { %303 = shalt.err (!%p300_p9)
}
 0x251   :  { %195 = dma.vmem_to_hbm [thread:$0]  %s190_s2, 128, %s411_s5, [#allocation5], %s314_s0, %s314_s0, %s315_s17  }
 0x252   :  { %308 = dma.done.wait [#allocation5], 128  }
 0x253   :  { %309 = vsyncadd [#allocation5], 4294967168 }
 0x254   :  { %199 = vsyncpa [#allocation4], 1 }
 0x255   :  { %200 = vsyncpa [#allocation7], 1 }
 0x256   :  { %201 = vsyncpa [#allocation5], 1 }

</bundles_post_ra>
